<compile_context>
chip_gen: v6e
topology: v6e:2x2x1
jax: 0.10.0
libtpu: 0.0.40
codegen_flags: <defaults>
</compile_context>

<pallas_src>
import functools
import math
from collections import namedtuple

import jax
import jax.numpy as jnp
from jax import lax
from jax.experimental import pallas as pl
from jax.experimental.pallas import tpu as pltpu


def _round_up(x, m):
    return ((x + m - 1) // m) * m


# ---------------------------------------------------------------------------
# Point-pair metrics kernel (fine inlier precision + registration RMSE).
# ---------------------------------------------------------------------------
def _point_metrics_kernel(params_ref, pts_ref, acc_ref, *,
                          num_chunks, radius_sq, two_streams):
    """grid = (num_passes [parallel], num_point_tiles [arbitrary/reduction]).

    pts_ref block : (1, planes, g_tile, 128) f32 coordinate planes; point i
                    lives at (g, lane) = (i // 128, i % 128).
    params_ref    : SMEM, 24 f32 per pass: A (9, row-major), B (9), bias c (3).
    acc_ref block : (1, 2, 8, 128); channel 0 accumulates inlier counts
                    (d^2 < radius^2, no sqrt), channel 1 accumulates distances
                    (sqrt on the EUP slot).
    d = A @ x + B @ y + c  with x = planes 0-2, y = planes 3-5 (two_streams).
    Padded lanes (zero coordinates) contribute exactly d = c; the wrapper
    subtracts that closed-form contribution instead of masking in-kernel.
    """
    t = pl.program_id(1)

    @pl.when(t == 0)
    def _():
        acc_ref[...] = jnp.zeros_like(acc_ref)

    base = pl.program_id(0) * 24

    def p(i):
        return params_ref[base + i]

    a00, a01, a02 = p(0), p(1), p(2)
    a10, a11, a12 = p(3), p(4), p(5)
    a20, a21, a22 = p(6), p(7), p(8)
    c0, c1, c2 = p(18), p(19), p(20)
    if two_streams:
        b00, b01, b02 = p(9), p(10), p(11)
        b10, b11, b12 = p(12), p(13), p(14)
        b20, b21, b22 = p(15), p(16), p(17)

    def body(j, carry):
        below, dist = carry
        sl = pl.ds(pl.multiple_of(j * 8, 8), 8)
        x0 = pts_ref[0, 0, sl, :]                     # (8, 128) dense vreg
        x1 = pts_ref[0, 1, sl, :]
        x2 = pts_ref[0, 2, sl, :]
        dx = a00 * x0 + a01 * x1 + a02 * x2 + c0
        dy = a10 * x0 + a11 * x1 + a12 * x2 + c1
        dz = a20 * x0 + a21 * x1 + a22 * x2 + c2
        if two_streams:
            y0 = pts_ref[0, 3, sl, :]
            y1 = pts_ref[0, 4, sl, :]
            y2 = pts_ref[0, 5, sl, :]
            dx = dx + b00 * y0 + b01 * y1 + b02 * y2
            dy = dy + b10 * y0 + b11 * y1 + b12 * y2
            dz = dz + b20 * y0 + b21 * y1 + b22 * y2
        d2 = dx * dx + dy * dy + dz * dz
        below = below + (d2 < radius_sq).astype(jnp.float32)
        dist = dist + jnp.sqrt(d2)
        return below, dist

    zeros = jnp.zeros((8, 128), jnp.float32)
    below, dist = lax.fori_loop(0, num_chunks, body, (zeros, zeros))
    acc_ref[0, 0, :, :] += below
    acc_ref[0, 1, :, :] += dist


# ---------------------------------------------------------------------------
# Coarse precision kernel: membership of predicted node pairs in the gt set.
# ---------------------------------------------------------------------------
def _coarse_precision_kernel(gt_ref, pred_ref, hit_ref, *, m_pad):
    """grid = (num_pred_tiles [parallel],).

    gt_ref   : SMEM int32[m_pad] packed gt keys (-1 = masked / padding).
    pred_ref : (rows_tile, 128) int32 block of predicted keys (-2 = padding).
    hit_ref  : (rows_tile, 128) f32, 1.0 iff the predicted key is in gt.
    Scalar-vs-vector compares only: no broadcast intermediate, no XLU reduce.
    """
    pred = pred_ref[...]
    hit0 = jnp.zeros(pred.shape, jnp.float32)

    def body(i, h):
        base = i * 8
        for u in range(8):                            # unrolled x8
            h = jnp.maximum(h, (pred == gt_ref[base + u]).astype(jnp.float32))
        return h

    hit_ref[...] = lax.fori_loop(0, m_pad // 8, body, hit0)


# ---------------------------------------------------------------------------
# Wrappers
# ---------------------------------------------------------------------------
_MetricPass = namedtuple("_MetricPass", ["x", "y", "mat_a", "mat_b", "bias", "n"])


def _pair_pass(ref_pts, src_pts, transform):
    """d = ref - (R @ src + t)  ->  A = I, B = -R, c = -t."""
    rot = transform[:3, :3].astype(jnp.float32)
    trans = transform[:3, 3].astype(jnp.float32)
    return _MetricPass(x=ref_pts, y=src_pts,
                       mat_a=jnp.eye(3, dtype=jnp.float32),
                       mat_b=-rot, bias=-trans, n=int(src_pts.shape[0]))


def _self_pass(pts, transform):
    """d = (R @ p + t) - p  ->  A = R - I, B = 0, c = t (single stream)."""
    rot = transform[:3, :3].astype(jnp.float32)
    trans = transform[:3, 3].astype(jnp.float32)
    return _MetricPass(x=pts, y=None,
                       mat_a=rot - jnp.eye(3, dtype=jnp.float32),
                       mat_b=jnp.zeros((3, 3), jnp.float32),
                       bias=trans, n=int(pts.shape[0]))


def _run_point_metrics(passes, radius, tile_pts=16384):
    """Returns [(inlier_fraction, mean_distance)] per pass, one pallas launch."""
    radius_sq = float(radius) ** 2
    nb = len(passes)
    max_n = max(max(p.n for p in passes), 1)
    tile_pts = min(tile_pts, _round_up(max_n, 1024))      # >= 1024 => g_tile % 8 == 0
    n_pad = _round_up(max_n, tile_pts)
    g_pad = n_pad // 128
    g_tile = tile_pts // 128
    two_streams = any(p.y is not None for p in passes)
    planes = 6 if two_streams else 3

    # TODO(synk): keep clouds in (3, N) layout upstream to skip this pad+transpose prep.
    # TODO(synk): optionally stream coordinates as bf16 on v5e if tolerances allow.
    bufs, rows = [], []
    for p in passes:
        buf = jnp.zeros((planes, n_pad), jnp.float32)
        buf = buf.at[0:3, :p.n].set(p.x.astype(jnp.float32).T)
        if two_streams and p.y is not None:
            buf = buf.at[3:6, :p.n].set(p.y.astype(jnp.float32).T)
        bufs.append(buf.reshape(planes, g_pad, 128))
        row = jnp.zeros((24,), jnp.float32)
        row = row.at[0:9].set(p.mat_a.reshape(9).astype(jnp.float32))
        row = row.at[9:18].set(p.mat_b.reshape(9).astype(jnp.float32))
        row = row.at[18:21].set(p.bias.astype(jnp.float32))
        rows.append(row)
    pts = jnp.stack(bufs)                                  # (nb, planes, g_pad, 128)
    params = jnp.concatenate(rows)                         # (nb * 24,) -> SMEM

    kernel = functools.partial(_point_metrics_kernel,
                               num_chunks=g_tile // 8,
                               radius_sq=radius_sq,
                               two_streams=two_streams)
    acc = pl.pallas_call(
        kernel,
        out_shape=jax.ShapeDtypeStruct((nb, 2, 8, 128), jnp.float32),
        grid=(nb, g_pad // g_tile),
        in_specs=[
            pl.BlockSpec(memory_space=pltpu.MemorySpace.SMEM),            # params
            pl.BlockSpec((1, planes, g_tile, 128), lambda b, t: (b, 0, t, 0)),
        ],
        out_specs=pl.BlockSpec((1, 2, 8, 128), lambda b, t: (b, 0, 0, 0)),
        # TODO(synk): try pltpu.CORE_PARALLEL on the pass axis for v7x's 2 TCs.
        compiler_params=pltpu.CompilerParams(
            dimension_semantics=("parallel", "arbitrary")),
    )(params, pts)

    results = []
    for i, p in enumerate(passes):
        below_sum = jnp.sum(acc[i, 0])
        dist_sum = jnp.sum(acc[i, 1])
        # Closed-form contribution of the (n_pad - n) zero-padded lanes (d = c).
        c = p.bias.astype(jnp.float32)
        d2_pad = c[0] * c[0] + c[1] * c[1] + c[2] * c[2]
        pad = float(n_pad - p.n)
        below_sum = below_sum - pad * (d2_pad < radius_sq).astype(jnp.float32)
        dist_sum = dist_sum - pad * jnp.sqrt(d2_pad)
        denom = float(max(p.n, 1))
        results.append((below_sum / denom, dist_sum / denom))
    return results


def coarse_precision(gt_node_corr_indices, gt_node_corr_overlaps,
                     ref_node_corr_indices, src_node_corr_indices,
                     ref_length_c, src_length_c, overlap_thr, rows_tile=64):
    """precision = mean over predicted node pairs of [pair in masked gt set]."""
    m = int(gt_node_corr_indices.shape[0])
    n = int(ref_node_corr_indices.shape[0])
    if ref_length_c * src_length_c >= 2 ** 31:
        # TODO(synk): split-key (two-compare) fallback for huge coarse grids.
        raise ValueError("coarse node-pair key would overflow int32")

    gt_key = jnp.where(
        gt_node_corr_overlaps.astype(jnp.float32) > overlap_thr,
        gt_node_corr_indices[:, 0].astype(jnp.int32) * src_length_c
        + gt_node_corr_indices[:, 1].astype(jnp.int32),
        -1)                                                # masked gt -> -1
    pred_key = (ref_node_corr_indices.astype(jnp.int32) * src_length_c
                + src_node_corr_indices.astype(jnp.int32))

    m_pad = _round_up(max(m, 1), 8)
    gt_keys = jnp.full((m_pad,), -1, jnp.int32).at[:m].set(gt_key)

    n_pad = _round_up(max(n, 1), 1024)
    rows = n_pad // 128
    rows_tile = min(rows_tile, rows)
    rows = _round_up(rows, rows_tile)
    n_pad = rows * 128
    pred_keys = jnp.full((n_pad,), -2, jnp.int32).at[:n].set(pred_key)
    pred_keys = pred_keys.reshape(rows, 128)

    kernel = functools.partial(_coarse_precision_kernel, m_pad=m_pad)
    hit = pl.pallas_call(
        kernel,
        out_shape=jax.ShapeDtypeStruct((rows, 128), jnp.float32),
        grid=(rows // rows_tile,),
        in_specs=[
            pl.BlockSpec(memory_space=pltpu.MemorySpace.SMEM),   # gt keys
            pl.BlockSpec((rows_tile, 128), lambda i: (i, 0)),
        ],
        out_specs=pl.BlockSpec((rows_tile, 128), lambda i: (i, 0)),
        compiler_params=pltpu.CompilerParams(
            dimension_semantics=("parallel",)),
    )(gt_keys, pred_keys)
    return jnp.sum(hit) / float(max(n, 1))


# ---------------------------------------------------------------------------
# Plain-JAX glue (trivial 3x3 / 4x4 scalar math)
# ---------------------------------------------------------------------------
def apply_transform(points, transform):
    rot = transform[:3, :3]
    trans = transform[:3, 3]
    return points @ rot.T + trans


def rigid_inverse(transform):
    """Closed-form inverse of a rigid 4x4: (R^T, -R^T t)."""
    transform = transform.astype(jnp.float32)
    rot = transform[:3, :3]
    trans = transform[:3, 3]
    inv = jnp.eye(4, dtype=jnp.float32)
    inv = inv.at[:3, :3].set(rot.T).at[:3, 3].set(-(rot.T @ trans))
    return inv


def isotropic_transform_error(gt_transform, est_transform):
    gt_rot = gt_transform[:3, :3]
    gt_trans = gt_transform[:3, 3]
    rot = est_transform[:3, :3]
    trans = est_transform[:3, 3]
    mat = rot.T @ gt_rot
    trace = jnp.trace(mat)
    x = jnp.clip(0.5 * (trace - 1.0), -1.0, 1.0)
    rre = jnp.arccos(x) * (180.0 / math.pi)
    rte = jnp.linalg.norm(gt_trans - trans)
    return rre, rte


# ---------------------------------------------------------------------------
# Evaluator
# ---------------------------------------------------------------------------
class Evaluator:
    def __init__(self, acceptance_overlap, acceptance_radius, rmse_threshold):
        self.acceptance_overlap = float(acceptance_overlap)
        self.acceptance_radius = float(acceptance_radius)
        self.acceptance_rmse = float(rmse_threshold)

    def evaluate_coarse(self, output_dict):
        ref_length_c = int(output_dict['ref_points_c'].shape[0])
        src_length_c = int(output_dict['src_points_c'].shape[0])
        return coarse_precision(
            output_dict['gt_node_corr_indices'],
            output_dict['gt_node_corr_overlaps'],
            output_dict['ref_node_corr_indices'],
            output_dict['src_node_corr_indices'],
            ref_length_c, src_length_c,
            self.acceptance_overlap)

    def evaluate_fine(self, output_dict, data_dict):
        transform = data_dict['transform']
        passes = [_pair_pass(output_dict['ref_corr_points'],
                             output_dict['src_corr_points'], transform)]
        (precision, _), = _run_point_metrics(passes, self.acceptance_radius)
        return precision

    def evaluate_registration(self, output_dict, data_dict):
        transform = data_dict['transform']
        est_transform = output_dict['estimated_transform']
        rre, rte = isotropic_transform_error(transform, est_transform)
        realignment = rigid_inverse(transform) @ est_transform.astype(jnp.float32)
        # Single-stream (3-plane) launch: realignment folded into A = R - I, c = t.
        passes = [_self_pass(output_dict['src_points'], realignment)]
        (_, rmse), = _run_point_metrics(passes, self.acceptance_radius)
        recall = (rmse < self.acceptance_rmse).astype(jnp.float32)
        return rre, rte, rmse, recall

    def forward(self, output_dict, data_dict):
        # Coarse/fine precision are computed (as in the torch reference) but not
        # returned.  Fine precision and registration RMSE share one fused launch.
        c_precision = self.evaluate_coarse(output_dict)               # noqa: F841
        transform = data_dict['transform']
        est_transform = output_dict['estimated_transform']
        rre, rte = isotropic_transform_error(transform, est_transform)
        realignment = rigid_inverse(transform) @ est_transform.astype(jnp.float32)
        passes = [
            _pair_pass(output_dict['ref_corr_points'],
                       output_dict['src_corr_points'], transform),
            _self_pass(output_dict['src_points'], realignment),
        ]
        (f_precision, _), (_, rmse) = _run_point_metrics(
            passes, self.acceptance_radius)                           # noqa: F841
        recall = (rmse < self.acceptance_rmse).astype(jnp.float32)
        return {'RRE': rre, 'RTE': rte, 'RMSE': rmse, 'RR': recall}

    __call__ = forward


# ---------------------------------------------------------------------------
# Pure-JAX reference (self-check) and deterministic example data
# ---------------------------------------------------------------------------
def _reference_eval(output_dict, data_dict, ov_thr, radius):
    ref_len = output_dict['ref_points_c'].shape[0]
    src_len = output_dict['src_points_c'].shape[0]
    gt = output_dict['gt_node_corr_indices']
    ov = output_dict['gt_node_corr_overlaps']
    gmap = jnp.zeros((ref_len, src_len), jnp.float32)
    gmap = gmap.at[gt[:, 0], gt[:, 1]].max((ov > ov_thr).astype(jnp.float32))
    pir = gmap[output_dict['ref_node_corr_indices'],
               output_dict['src_node_corr_indices']].mean()

    transform = data_dict['transform']
    src_t = apply_transform(output_dict['src_corr_points'], transform)
    d = jnp.linalg.norm(output_dict['ref_corr_points'] - src_t, axis=1)
    ir = (d < radius).astype(jnp.float32).mean()

    realign = jnp.linalg.inv(transform) @ output_dict['estimated_transform']
    sp = output_dict['src_points']
    sp_t = apply_transform(sp, realign)
    rmse = jnp.linalg.norm(sp_t - sp, axis=1).mean()
    return pir, ir, rmse


def _make_transform(angle, t):
    c, s = math.cos(angle), math.sin(angle)
    rot = jnp.array([[c, -s, 0.0], [s, c, 0.0], [0.0, 0.0, 1.0]], dtype=jnp.float32)
    T = jnp.eye(4, dtype=jnp.float32)
    T = T.at[:3, :3].set(rot).at[:3, 3].set(jnp.array(t, dtype=jnp.float32))
    return T


if __name__ == "__main__":
    key = jax.random.PRNGKey(0)
    keys = jax.random.split(key, 8)

    n_ref_c, n_src_c = 16, 20        # coarse node counts
    n_gt_corr, n_pred_corr = 24, 32  # coarse correspondences
    n_fine, n_src_pts = 32, 64       # fine corr points / full src cloud

    transform = _make_transform(0.20, (0.10, -0.20, 0.30))
    est_transform = _make_transform(0.23, (0.12, -0.18, 0.32))

    ref_points_c = jax.random.normal(keys[0], (n_ref_c, 3), dtype=jnp.float32)
    src_points_c = jax.random.normal(keys[1], (n_src_c, 3), dtype=jnp.float32)

    gt_ref_idx = jax.random.randint(keys[2], (n_gt_corr,), 0, n_ref_c)
    gt_src_idx = jax.random.randint(keys[3], (n_gt_corr,), 0, n_src_c)
    gt_node_corr_indices = jnp.stack([gt_ref_idx, gt_src_idx], axis=1).astype(jnp.int32)
    gt_node_corr_overlaps = jax.random.uniform(keys[4], (n_gt_corr,), dtype=jnp.float32)

    ref_node_corr_indices = jax.random.randint(keys[5], (n_pred_corr,), 0, n_ref_c).astype(jnp.int32)
    src_node_corr_indices = jax.random.randint(keys[6], (n_pred_corr,), 0, n_src_c).astype(jnp.int32)

    src_corr_points = jax.random.normal(keys[7], (n_fine, 3), dtype=jnp.float32)
    noise = 0.05 * jax.random.normal(jax.random.PRNGKey(1), (n_fine, 3), dtype=jnp.float32)
    ref_corr_points = apply_transform(src_corr_points, transform) + noise

    src_points = jax.random.normal(jax.random.PRNGKey(2), (n_src_pts, 3), dtype=jnp.float32)

    output_dict = {
        'ref_points_c': ref_points_c,
        'src_points_c': src_points_c,
        'gt_node_corr_indices': gt_node_corr_indices,
        'gt_node_corr_overlaps': gt_node_corr_overlaps,
        'ref_node_corr_indices': ref_node_corr_indices,
        'src_node_corr_indices': src_node_corr_indices,
        'ref_corr_points': ref_corr_points,
        'src_corr_points': src_corr_points,
        'estimated_transform': est_transform,
        'src_points': src_points,
    }
    data_dict = {'transform': transform}

    evaluator = Evaluator(acceptance_overlap=0.1,
                          acceptance_radius=0.1,
                          rmse_threshold=0.2)

    result = evaluator(output_dict, data_dict)
    result = {k: jax.block_until_ready(v) for k, v in result.items()}

    # Cross-check the Pallas kernels against a pure-JAX reference.
    pir_r, ir_r, rmse_r = _reference_eval(output_dict, data_dict,
                                          evaluator.acceptance_overlap,
                                          evaluator.acceptance_radius)

    pir_k = jax.block_until_ready(evaluator.evaluate_coarse(output_dict))
    ir_k = jax.block_until_ready(evaluator.evaluate_fine(output_dict, data_dict))
    _, _, rmse_k, _ = evaluator.evaluate_registration(output_dict, data_dict)
    rmse_k = jax.block_until_ready(rmse_k)

    assert abs(float(pir_k) - float(pir_r)) < 1e-4, (pir_k, pir_r)
    assert abs(float(ir_k) - float(ir_r)) < 1e-4, (ir_k, ir_r)
    assert abs(float(rmse_k) - float(rmse_r)) < 1e-4, (rmse_k, rmse_r)
    assert abs(float(result['RMSE']) - float(rmse_r)) < 1e-4, (result['RMSE'], rmse_r)

    print("KERNEL_OK")
</pallas_src>

<mosaic_0001>
module attributes {stable_mosaic.version = 11 : i64} {
  func.func @_coarse_precision_kernel(%arg0: i32, %arg1: memref<24xi32, #tpu.memory_space<smem>>, %arg2: memref<8x128xi32, #tpu.memory_space<vmem>>, %arg3: memref<8x128xf32, #tpu.memory_space<vmem>>) attributes {dimension_semantics = [#tpu.dimension_semantics<parallel>], iteration_bounds = array<i64: 1>, scalar_prefetch = 0 : i64, scratch_operands = 0 : i64, tpu.core_type = #tpu.core_type<tc>, window_params = [{transform_indices = @transform_0, window_bounds = array<i64: 24>}, {transform_indices = @transform_1, window_bounds = array<i64: 8, 128>}, {transform_indices = @transform_2, window_bounds = array<i64: 8, 128>}]} {
    %c0 = arith.constant 0 : index
    %c0_0 = arith.constant 0 : index
    %0 = vector.load %arg2[%c0, %c0_0] : memref<8x128xi32, #tpu.memory_space<vmem>>, vector<8x128xi32>
    %cst = arith.constant 0.000000e+00 : f32
    %1 = vector.broadcast %cst : f32 to vector<8x128xf32>
    %c0_i32 = arith.constant 0 : i32
    %c3_i32 = arith.constant 3 : i32
    %2 = arith.addi %c0_i32, %c3_i32 : i32
    %c1_i32 = arith.constant 1 : i32
    %3 = scf.for %arg4 = %c0_i32 to %2 step %c1_i32 iter_args(%arg5 = %1) -> (vector<8x128xf32>)  : i32 {
      %c8_i32 = arith.constant 8 : i32
      %5 = arith.muli %arg4, %c8_i32 : i32
      %c0_i32_4 = arith.constant 0 : i32
      %6 = arith.addi %5, %c0_i32_4 : i32
      %7 = arith.index_cast %6 : i32 to index
      %8 = memref.load %arg1[%7] : memref<24xi32, #tpu.memory_space<smem>>
      %9 = vector.broadcast %8 : i32 to vector<8x128xi32>
      %10 = arith.cmpi eq, %0, %9 : vector<8x128xi32>
      %11 = arith.extui %10 : vector<8x128xi1> to vector<8x128xi32>
      %12 = arith.sitofp %11 : vector<8x128xi32> to vector<8x128xf32>
      %13 = arith.maximumf %arg5, %12 : vector<8x128xf32>
      %c1_i32_5 = arith.constant 1 : i32
      %14 = arith.addi %5, %c1_i32_5 : i32
      %15 = arith.index_cast %14 : i32 to index
      %16 = memref.load %arg1[%15] : memref<24xi32, #tpu.memory_space<smem>>
      %17 = vector.broadcast %16 : i32 to vector<8x128xi32>
      %18 = arith.cmpi eq, %0, %17 : vector<8x128xi32>
      %19 = arith.extui %18 : vector<8x128xi1> to vector<8x128xi32>
      %20 = arith.sitofp %19 : vector<8x128xi32> to vector<8x128xf32>
      %21 = arith.maximumf %13, %20 : vector<8x128xf32>
      %c2_i32 = arith.constant 2 : i32
      %22 = arith.addi %5, %c2_i32 : i32
      %23 = arith.index_cast %22 : i32 to index
      %24 = memref.load %arg1[%23] : memref<24xi32, #tpu.memory_space<smem>>
      %25 = vector.broadcast %24 : i32 to vector<8x128xi32>
      %26 = arith.cmpi eq, %0, %25 : vector<8x128xi32>
      %27 = arith.extui %26 : vector<8x128xi1> to vector<8x128xi32>
      %28 = arith.sitofp %27 : vector<8x128xi32> to vector<8x128xf32>
      %29 = arith.maximumf %21, %28 : vector<8x128xf32>
      %c3_i32_6 = arith.constant 3 : i32
      %30 = arith.addi %5, %c3_i32_6 : i32
      %31 = arith.index_cast %30 : i32 to index
      %32 = memref.load %arg1[%31] : memref<24xi32, #tpu.memory_space<smem>>
      %33 = vector.broadcast %32 : i32 to vector<8x128xi32>
      %34 = arith.cmpi eq, %0, %33 : vector<8x128xi32>
      %35 = arith.extui %34 : vector<8x128xi1> to vector<8x128xi32>
      %36 = arith.sitofp %35 : vector<8x128xi32> to vector<8x128xf32>
      %37 = arith.maximumf %29, %36 : vector<8x128xf32>
      %c4_i32 = arith.constant 4 : i32
      %38 = arith.addi %5, %c4_i32 : i32
      %39 = arith.index_cast %38 : i32 to index
      %40 = memref.load %arg1[%39] : memref<24xi32, #tpu.memory_space<smem>>
      %41 = vector.broadcast %40 : i32 to vector<8x128xi32>
      %42 = arith.cmpi eq, %0, %41 : vector<8x128xi32>
      %43 = arith.extui %42 : vector<8x128xi1> to vector<8x128xi32>
      %44 = arith.sitofp %43 : vector<8x128xi32> to vector<8x128xf32>
      %45 = arith.maximumf %37, %44 : vector<8x128xf32>
      %c5_i32 = arith.constant 5 : i32
      %46 = arith.addi %5, %c5_i32 : i32
      %47 = arith.index_cast %46 : i32 to index
      %48 = memref.load %arg1[%47] : memref<24xi32, #tpu.memory_space<smem>>
      %49 = vector.broadcast %48 : i32 to vector<8x128xi32>
      %50 = arith.cmpi eq, %0, %49 : vector<8x128xi32>
      %51 = arith.extui %50 : vector<8x128xi1> to vector<8x128xi32>
      %52 = arith.sitofp %51 : vector<8x128xi32> to vector<8x128xf32>
      %53 = arith.maximumf %45, %52 : vector<8x128xf32>
      %c6_i32 = arith.constant 6 : i32
      %54 = arith.addi %5, %c6_i32 : i32
      %55 = arith.index_cast %54 : i32 to index
      %56 = memref.load %arg1[%55] : memref<24xi32, #tpu.memory_space<smem>>
      %57 = vector.broadcast %56 : i32 to vector<8x128xi32>
      %58 = arith.cmpi eq, %0, %57 : vector<8x128xi32>
      %59 = arith.extui %58 : vector<8x128xi1> to vector<8x128xi32>
      %60 = arith.sitofp %59 : vector<8x128xi32> to vector<8x128xf32>
      %61 = arith.maximumf %53, %60 : vector<8x128xf32>
      %c7_i32 = arith.constant 7 : i32
      %62 = arith.addi %5, %c7_i32 : i32
      %63 = arith.index_cast %62 : i32 to index
      %64 = memref.load %arg1[%63] : memref<24xi32, #tpu.memory_space<smem>>
      %65 = vector.broadcast %64 : i32 to vector<8x128xi32>
      %66 = arith.cmpi eq, %0, %65 : vector<8x128xi32>
      %67 = arith.extui %66 : vector<8x128xi1> to vector<8x128xi32>
      %68 = arith.sitofp %67 : vector<8x128xi32> to vector<8x128xf32>
      %69 = arith.maximumf %61, %68 : vector<8x128xf32>
      scf.yield %69 : vector<8x128xf32>
    }
    %c3_i32_1 = arith.constant 3 : i32
    %c0_2 = arith.constant 0 : index
    %c0_3 = arith.constant 0 : index
    %4 = vector.load %arg3[%c0_2, %c0_3] : memref<8x128xf32, #tpu.memory_space<vmem>>, vector<8x128xf32>
    tpu.vector_store %arg3[%c0_2, %c0_3], %3 {strides = array<i32>} : memref<8x128xf32, #tpu.memory_space<vmem>>, vector<8x128xf32>,
    return
  }
  func.func @transform_0(%arg0: i32) -> i32 {
    %c0_i32 = arith.constant 0 : i32
    %c0_i32_0 = arith.constant 0 : i32
    return %c0_i32 : i32
  }
  func.func @transform_1(%arg0: i32) -> (i32, i32) {
    %c0_i32 = arith.constant 0 : i32
    %c0_i32_0 = arith.constant 0 : i32
    return %arg0, %c0_i32 : i32, i32
  }
  func.func @transform_2(%arg0: i32) -> (i32, i32) {
    %c0_i32 = arith.constant 0 : i32
    %c0_i32_0 = arith.constant 0 : i32
    return %arg0, %c0_i32 : i32, i32
  }
}

</mosaic_0001>

<bundles_post_ra>
// kernel: tpu_custom_call.1
= control target key start
LH: loop header
LB: loop body
LE: loop exit
PB: predicated region body
PF: predicated region fallthrough
CT: control target
= control target key end

     0   :  { %7 = vsyncpa [#allocation5], 0  ;;  %s260_s0 = inlined_call_operand.hbm [shape: s32[24], index: 0, kind: input, shape index: {}]   ;;  %s261_s1 = inlined_call_operand.hbm [shape: s32[8,128], index: 1, kind: input, shape index: {}]   ;;  %s262_s2 = inlined_call_operand.hbm [shape: f32[8,128], index: 2, kind: output, shape index: {}]  }
   0x1   :  { %8 = vsyncpa [#allocation3], 0 }
   0x2   :  { %9 = vsyncpa [#allocation4], 0  ;;  %s223_s9 = smov [#allocation2]   ;;  %s224_s12 = smov [#allocation6]  }
   0x3   :  { %17 = dma.hbm_to_smem %s260_s0, 16, %s223_s9, [#allocation5]  }
   0x4   :  { %s24_s13 = sshll.u32 %s224_s12, 4  ;;  %s25_s13 = int_to_ptr.vmem [resolvable:$true] %s24_s13 }
   0x5   :  { %s169_s14 = scalar_lea.vmem %s25_s13, 128  ;;  %p174_p1 = scmp.lt.s32.totalorder %s25_s13, %s25_s13 }
   0x6   :  { %p170_p0 = scmp.ne.s32.totalorder %s25_s13, %s169_s14  ;;  %p175_p2 = scmp.lt.s32.totalorder %s169_s14, %s169_s14 }
   0x8   :  { %p176_p3 = por %p175_p2, %p174_p1 }
   0xa   :  { %p177_p4 = pnand %p176_p3, %p170_p0 }
   0xc   :  { %180 = shalt.err (!%p177_p4)
}
   0xd   :  { %27 = dma.hbm_to_vmem [thread:$0]  %s261_s1, 128, %s25_s13, [#allocation3]  }
   0xe   :  { %209 = dma.done.wait [#allocation5], 16  }
   0xf   :  { %210 = vsyncadd [#allocation5], 4294967280 }
  0x10   :  { %211 = dma.done.wait [#allocation3], 128  }
  0x11   :  { %212 = vsyncadd [#allocation3], 4294967168 }
  0x12   :  { %34 = sfence }
  0x13   :  { %v35_v0 = vld [vmem:[#allocation6] sm:$0xff]  ;;  %v215_v1 = vmov 0.0   ;;  %s248_s0 = smov 0  }
  0x14 LB: > { %s124_s17 = sshll.u32 %s221_s0, 3  ;;  %v225_v4 = vmov 0.0   ;;  %s41_s0 = sadd.s32 1, %s221_s0   ;;  %s221_s0 = sphi %s248_s0, %s41_s0   ;;  %v217_v1 = vphi %v215_v1, %v216_v1  }
  0x15   : > { %s44_s18 = sld [smem:[#allocation2 + %s124_s17]]  ;;  %s50_s19 = sadd.s32 1, %s124_s17 }
  0x16   : > { %s51_s1 = sld [smem:[#allocation2 + %s50_s19]]  ;;  %s57_s20 = sadd.s32 2, %s124_s17 }
  0x17   : > { %s58_s21 = sld [smem:[#allocation2 + %s57_s20]]  ;;  %s64_s22 = sadd.s32 3, %s124_s17 }
  0x18   : > { %s65_s23 = sld [smem:[#allocation2 + %s64_s22]]  ;;  %s71_s24 = sadd.s32 4, %s124_s17 }
  0x19   : > { %s72_s25 = sld [smem:[#allocation2 + %s71_s24]]  ;;  %s78_s26 = sadd.s32 5, %s124_s17 }
  0x1a   : > { %s79_s27 = sld [smem:[#allocation2 + %s78_s26]]  ;;  %s85_s28 = sadd.s32 6, %s124_s17 }
  0x1b   : > { %v45_v2 = vstv %s44_s18  ;;  %s86_s29 = sld [smem:[#allocation2 + %s85_s28]]  ;;  %s92_s30 = sadd.s32 7, %s124_s17 }
  0x1c   : > { %vm46_vm0 = vcmp.eq.s32.totalorder %v35_v0, %v45_v2  ;;  %v52_v3 = vstv %s51_s1  ;;  %s93_s3 = sld [smem:[#allocation2 + %s92_s30]]  ;;  %p38_p5 = scmp.ge.s32.totalorder %s41_s0, 3  }
  0x1d   : > { %v125_v5 = vsel %vm46_vm0, 1.0, %v225_v4  ;;  %vm53_vm1 = vcmp.eq.s32.totalorder %v35_v0, %v52_v3  ;;  %v59_v6 = vstv %s58_s21  ;;  %s226_s4 = smov (%p38_p5), [#allocation7]  }
  0x1e   : > { %v49_v7 = vmax.f32 %v217_v1, %v125_v5  ;;  %v126_v8 = vsel %vm53_vm1, 1.0, %v225_v4  ;;  %vm60_vm2 = vcmp.eq.s32.totalorder %v35_v0, %v59_v6  ;;  %v66_v9 = vstv %s65_s23  ;;  %s106_s5 = sshll.u32 (%p38_p5), %s226_s4, 4  ;;  %s107_s5 = int_to_ptr.vmem [resolvable:$true] %s106_s5 }
  0x1f   : > { %v127_v10 = vsel %vm60_vm2, 1.0, %v225_v4  ;;  %vm67_vm3 = vcmp.eq.s32.totalorder %v35_v0, %v66_v9  ;;  %v73_v11 = vstv %s72_s25  ;;  %s181_s6 = scalar_lea.vmem (%p38_p5), %s107_s5, 128  ;;  %p186_p7 = scmp.lt.s32.totalorder (%p38_p5), %s107_s5, %s107_s5 }
  0x20   : > { %v56_v12 = vmax.f32 %v49_v7, %v126_v8  ;;  %vm74_vm4 = vcmp.eq.s32.totalorder %v35_v0, %v73_v11  ;;  %v80_v13 = vstv %s79_s27  ;;  %v128_v14 = vsel %vm67_vm3, 1.0, %v225_v4  ;;  %p182_p6 = scmp.ne.s32.totalorder (%p38_p5), %s107_s5, %s181_s6  ;;  %p187_p8 = scmp.lt.s32.totalorder (%p38_p5), %s181_s6, %s181_s6 }
  0x21   : > { %v87_v15 = vstv %s86_s29  ;;  %vm81_vm5 = vcmp.eq.s32.totalorder %v35_v0, %v80_v13  ;;  %v129_v17 = vsel %vm74_vm4, 1.0, %v225_v4 }
  0x22   : > { %v63_v16 = vmax.f32 %v56_v12, %v127_v10  ;;  %v94_v18 = vstv %s93_s3  ;;  %vm88_vm6 = vcmp.eq.s32.totalorder %v35_v0, %v87_v15  ;;  %v130_v20 = vsel %vm81_vm5, 1.0, %v225_v4  ;;  %p188_p9 = por (%p38_p5), %p187_p8, %p186_p7 }
  0x23   : > { %vm95_vm7 = vcmp.eq.s32.totalorder %v35_v0, %v94_v18  ;;  %v131_v22 = vsel %vm88_vm6, 1.0, %v225_v4 }
  0x24   : > { %v70_v19 = vmax.f32 %v63_v16, %v128_v14  ;;  %v132_v24 = vsel %vm95_vm7, 1.0, %v225_v4  ;;  %p189_p10 = pnand (%p38_p5), %p188_p9, %p182_p6 }
  0x26   : > { %v77_v21 = vmax.f32 %v70_v19, %v129_v17 }
  0x28   : > { %v84_v23 = vmax.f32 %v77_v21, %v130_v20 }
  0x2a   : > { %v91_v25 = vmax.f32 %v84_v23, %v131_v22  ;;  %40 = sbr.rel (!%p38_p5) target bundleno = 20 (0x14), region = 43 }
  0x2c   : > { %v98_v26 = vmax.f32 %v91_v25, %v132_v24  }
  0x2e   : > { %v216_v1 = vmov %v98_v26   ;;  %99 = vst [vmem:[#allocation7] sm:$0xff] (%p38_p5), %v98_v26 }
  0x2f   :  { %192 = shalt.err (!%p189_p10)
}
  0x30   :  { %109 = dma.vmem_to_hbm [thread:$0]  %s107_s5, 128, %s262_s2, [#allocation4]  }
  0x31   :  { %213 = dma.done.wait [#allocation4], 128  }
  0x32   :  { %214 = vsyncadd [#allocation4], 4294967168 }
  0x33   :  { %113 = vsyncpa [#allocation3], 1 }
  0x34   :  { %114 = vsyncpa [#allocation4], 1 }
  0x35   :  { %115 = vsyncpa [#allocation5], 1 }

</bundles_post_ra>
